<compile_context>
chip_gen: v7x
topology: tpu7x:2x2x1
jax: 0.10.0
libtpu: 0.0.40
codegen_flags: <defaults>
</compile_context>

<pallas_src>
import functools

import jax
import jax.numpy as jnp
import numpy as np
from jax.experimental import pallas as pl
from jax.experimental.pallas import tpu as pltpu

_MASK_BIAS = -1e30  # finite "-inf": avoids inf - inf -> NaN on fully padded rows


def _sdpa_kernel(q_ref, k_ref, v_ref, klen_ref, out_ref, *attn_refs, inv_temperature):
    q = q_ref[...]        # (blk, 1, D)   caller dtype
    k = k_ref[...]        # (blk, TS, D)  caller dtype
    v = v_ref[...]        # (blk, TS, DV) caller dtype
    klen = klen_ref[...]  # (blk, 1, 1)   int32 valid key length per row

    # energy[b, 0, t] = sum_d q[b, 0, d] * k[b, t, d]  -- batched MXU matmul
    energy = jnp.einsum("bqd,btd->bqt", q, k,
                        preferred_element_type=jnp.float32)       # (blk, 1, TS) f32

    # Key-padding mask generated in-kernel: position t is padded iff t >= k_len.
    t_idx = jax.lax.broadcasted_iota(jnp.int32, energy.shape, 2)  # (blk, 1, TS)
    pad = t_idx >= klen                                           # bool

    scaled = energy * jnp.float32(inv_temperature)
    masked = jnp.where(pad, jnp.float32(_MASK_BIAS), scaled)

    # Numerically stable softmax over the key axis (f32, exact denominator).
    m = jnp.max(masked, axis=-1, keepdims=True)
    e = jnp.exp(masked - m)
    s = jnp.sum(e, axis=-1, keepdims=True)
    attn = e / s                                                  # (blk, 1, TS) f32

    if attn_refs:  # attention-map output is optional (return_attn)
        attn_refs[0][...] = attn.astype(attn_refs[0].dtype)

    # output[b, 0, d] = sum_t attn[b, 0, t] * v[b, t, d]  -- batched MXU matmul
    out = jnp.einsum("bqt,btd->bqd", attn.astype(v.dtype), v,
                     preferred_element_type=jnp.float32)          # (blk, 1, DV) f32
    out_ref[...] = out.astype(out_ref.dtype)


def _round_up(x, m):
    return ((x + m - 1) // m) * m


def _vmem_budget_bytes():
    """Scoped-VMEM limit to request, derived from the chip's physical VMEM."""
    cap = None
    try:
        info = pltpu.get_tpu_info()
        cap = int(getattr(info, "vmem_capacity_bytes", 0)) or None
    except Exception:  # pragma: no cover - fall back to device_kind sniffing
        cap = None
    if cap is None:
        try:
            kind = jax.devices()[0].device_kind.lower()
        except Exception:  # pragma: no cover
            kind = ""
        if any(tag in kind for tag in ("v7", "7x", "tpu7")):
            cap = 64 << 20    # v7x: 64 MiB physical VMEM per TensorCore
        else:
            cap = 128 << 20   # v5e / v6e: 128 MiB physical VMEM
    if cap <= (64 << 20):
        return 48 << 20       # v7x-class: request 48 of 64 MiB
    return 100 << 20          # v5e/v6e: request 100 of 128 MiB


def _pick_block_bn(bn, ts, d, dv, itemsize, vmem_limit_bytes):
    """Largest BN block that fits the scoped VMEM with double-buffered DMA."""
    ts_lanes = _round_up(ts, 128)
    d_lanes = _round_up(d, 128)
    dv_lanes = _round_up(dv, 128)
    ts_sub = _round_up(ts, 8)

    # Double-buffered I/O tiles, per BN row of a block (lane/sublane padded).
    k_row = ts_sub * d_lanes * itemsize
    v_row = ts_sub * dv_lanes * itemsize
    q_row = 8 * d_lanes * itemsize          # (1, D) slice pads to 8 sublanes
    klen_row = 8 * 128 * 4                  # (1, 1) int32 pads to an (8,128) tile
    out_row = 8 * dv_lanes * itemsize
    attn_row = 8 * ts_lanes * itemsize
    io_row = k_row + v_row + q_row + klen_row + out_row + attn_row

    # In-kernel f32 softmax temporaries (energy / exp / attn + f32 out), single-buffered.
    work_row = 3 * 8 * ts_lanes * 4 + 8 * dv_lanes * 4

    usable = int(vmem_limit_bytes * 0.75)   # headroom for Mosaic internal scratch
    blk = max(1, usable // (2 * io_row + work_row))

    # Keep >= ~4 grid steps so both v7x TensorCores get work and the
    # double-buffered pipeline has iterations to overlap.
    blk = min(blk, max(1, -(-bn // 4)))
    blk = min(blk, bn, 1024)

    # Prefer a divisor of bn in [blk//2, blk] to avoid host-side padding;
    # otherwise keep blk and let the caller pad BN up to a multiple of blk.
    for cand in range(blk, max(1, blk // 2) - 1, -1):
        if bn % cand == 0:
            return cand
    return blk


def scale_dot_attention(q, k, v, k_len, *, temperature, num_head, return_attn=True):
    """Pallas implementation of ScaleDotAttention.forward (mask from compute_mask)."""
    bn, ts, d = k.shape
    dv = v.shape[-1]
    b = bn // num_head
    itemsize = q.dtype.itemsize

    q3 = q.reshape(bn, 1, d)
    # Per-(batch, head) row valid length; row index = batch * num_head + head.
    klen_rows = jnp.repeat(k_len.astype(jnp.int32), num_head).reshape(bn, 1, 1)

    vmem_limit = _vmem_budget_bytes()
    blk = _pick_block_bn(bn, ts, d, dv, itemsize, vmem_limit)

    # Pad BN to a multiple of blk if no good divisor was found (padded rows are
    # fully masked -> uniform attention, finite math, and sliced off below).
    bn_pad = -(-bn // blk) * blk
    k_in, v_in = k, v
    if bn_pad != bn:
        extra = bn_pad - bn
        q3 = jnp.pad(q3, ((0, extra), (0, 0), (0, 0)))
        k_in = jnp.pad(k, ((0, extra), (0, 0), (0, 0)))
        v_in = jnp.pad(v, ((0, extra), (0, 0), (0, 0)))
        klen_rows = jnp.pad(klen_rows, ((0, extra), (0, 0), (0, 0)))
    grid = (bn_pad // blk,)

    kernel = functools.partial(_sdpa_kernel, inv_temperature=1.0 / float(temperature))

    out_shapes = [jax.ShapeDtypeStruct((bn_pad, 1, dv), q.dtype)]
    out_specs = [pl.BlockSpec((blk, 1, dv), lambda i: (i, 0, 0))]
    if return_attn:
        out_shapes.append(jax.ShapeDtypeStruct((bn_pad, 1, ts), q.dtype))
        out_specs.append(pl.BlockSpec((blk, 1, ts), lambda i: (i, 0, 0)))

    flops = 2 * bn * ts * (d + dv)
    bytes_accessed = (bn * d + bn * ts * d + bn * ts * dv + bn * dv) * itemsize + bn * 4
    if return_attn:
        bytes_accessed += bn * ts * itemsize

    results = pl.pallas_call(
        kernel,
        grid=grid,
        out_shape=tuple(out_shapes),
        in_specs=[
            pl.BlockSpec((blk, 1, d), lambda i: (i, 0, 0)),    # q
            pl.BlockSpec((blk, ts, d), lambda i: (i, 0, 0)),   # k
            pl.BlockSpec((blk, ts, dv), lambda i: (i, 0, 0)),  # v
            pl.BlockSpec((blk, 1, 1), lambda i: (i, 0, 0)),    # per-row k_len
        ],
        out_specs=tuple(out_specs),
        compiler_params=pltpu.CompilerParams(
            dimension_semantics=("parallel",),
            vmem_limit_bytes=vmem_limit,
        ),
        cost_estimate=pl.CostEstimate(
            flops=flops, transcendentals=bn * ts, bytes_accessed=bytes_accessed
        ),
    )(q3, k_in, v_in, klen_rows)

    out3 = results[0]
    output = out3[:bn].reshape(bn, dv)
    if not return_attn:
        return output, None
    attn3 = results[1]
    attn = attn3[:bn].reshape(b, num_head, ts)
    return output, attn


def _reference(q, k, v, k_len, *, temperature, num_head):
    bn, ts, d = k.shape
    b = bn // num_head
    t_idx = jnp.arange(ts)[None, :]
    mask_b = t_idx >= k_len[:, None]
    mask = jnp.repeat(mask_b[:, None, :], num_head, axis=1).reshape(bn, ts)
    energy = jnp.einsum("bd,btd->bt", q, k)
    scaled = energy / temperature
    masked = jnp.where(mask, -jnp.inf, scaled)
    attn = jax.nn.softmax(masked, axis=-1)
    out = jnp.einsum("bt,btd->bd", attn, v)
    return out, attn.reshape(b, num_head, ts)


if __name__ == "__main__":
    B, NUM_HEAD, TS, D, DV = 2, 4, 8, 32, 32
    BN = B * NUM_HEAD
    TEMPERATURE = float(np.sqrt(D))

    key = jax.random.PRNGKey(0)
    kq, kk, kv = jax.random.split(key, 3)
    q = jax.random.normal(kq, (BN, D), dtype=jnp.float32)
    k = jax.random.normal(kk, (BN, TS, D), dtype=jnp.float32)
    v = jax.random.normal(kv, (BN, TS, DV), dtype=jnp.float32)
    k_len = jnp.array([TS, 5], dtype=jnp.int32)   # per-batch valid key lengths

    out, attn = scale_dot_attention(
        q, k, v, k_len, temperature=TEMPERATURE, num_head=NUM_HEAD
    )
    out = jax.block_until_ready(out)
    attn = jax.block_until_ready(attn)

    ref_out, ref_attn = _reference(
        q, k, v, k_len, temperature=TEMPERATURE, num_head=NUM_HEAD
    )
    # Tolerance accounts for default-precision matmuls in the XLA reference.
    np.testing.assert_allclose(np.asarray(out), np.asarray(ref_out), rtol=3e-3, atol=3e-3)
    np.testing.assert_allclose(np.asarray(attn), np.asarray(ref_attn), rtol=3e-3, atol=3e-3)

    assert out.shape == (BN, DV) and attn.shape == (B, NUM_HEAD, TS)
    print("KERNEL_OK")
</pallas_src>

<mosaic_0001>
module attributes {stable_mosaic.version = 11 : i64} {
  func.func @_sdpa_kernel(%arg0: i32, %arg1: memref<2x1x32xf32, #tpu.memory_space<vmem>>, %arg2: memref<2x8x32xf32, #tpu.memory_space<vmem>>, %arg3: memref<2x8x32xf32, #tpu.memory_space<vmem>>, %arg4: memref<2x1x1xi32, #tpu.memory_space<vmem>>, %arg5: memref<2x1x32xf32, #tpu.memory_space<vmem>>, %arg6: memref<2x1x8xf32, #tpu.memory_space<vmem>>) attributes {dimension_semantics = [#tpu.dimension_semantics<parallel>], iteration_bounds = array<i64: 4>, scalar_prefetch = 0 : i64, scratch_operands = 0 : i64, tpu.core_type = #tpu.core_type<tc>, window_params = [{transform_indices = @transform_0, window_bounds = array<i64: 2, 1, 32>}, {transform_indices = @transform_1, window_bounds = array<i64: 2, 8, 32>}, {transform_indices = @transform_2, window_bounds = array<i64: 2, 8, 32>}, {transform_indices = @transform_3, window_bounds = array<i64: 2, 1, 1>}, {transform_indices = @transform_4, window_bounds = array<i64: 2, 1, 32>}, {transform_indices = @transform_5, window_bounds = array<i64: 2, 1, 8>}]} {
    %c0 = arith.constant 0 : index
    %c0_0 = arith.constant 0 : index
    %c0_1 = arith.constant 0 : index
    %0 = vector.load %arg1[%c0, %c0_0, %c0_1] : memref<2x1x32xf32, #tpu.memory_space<vmem>>, vector<2x1x32xf32>
    %c0_2 = arith.constant 0 : index
    %c0_3 = arith.constant 0 : index
    %c0_4 = arith.constant 0 : index
    %1 = vector.load %arg2[%c0_2, %c0_3, %c0_4] : memref<2x8x32xf32, #tpu.memory_space<vmem>>, vector<2x8x32xf32>
    %c0_5 = arith.constant 0 : index
    %c0_6 = arith.constant 0 : index
    %c0_7 = arith.constant 0 : index
    %2 = vector.load %arg3[%c0_5, %c0_6, %c0_7] : memref<2x8x32xf32, #tpu.memory_space<vmem>>, vector<2x8x32xf32>
    %c0_8 = arith.constant 0 : index
    %c0_9 = arith.constant 0 : index
    %c0_10 = arith.constant 0 : index
    %3 = vector.load %arg4[%c0_8, %c0_9, %c0_10] : memref<2x1x1xi32, #tpu.memory_space<vmem>>, vector<2x1x1xi32>
    "tpu.trace_start"() <{level = 10 : i32, message = "bqd,btd->bqt"}> : () -> ()
    %cst = arith.constant dense<0.000000e+00> : vector<2x1x8xf32>
    %4 = tpu.matmul %0, %1, %cst {dimension_numbers = #tpu.dot_dimension_numbers<[2], [2], [1], [1], [0, 0, 0, 1, 1, 1], [0], [0]>} : vector<2x1x32xf32>, vector<2x8x32xf32>, vector<2x1x8xf32> -> vector<2x1x8xf32>
    "tpu.trace_stop"() : () -> ()
    %5 = tpu.iota {dimensions = array<i32: 2>} : vector<2x1x8xi32>
    %6 = vector.broadcast %3 : vector<2x1x1xi32> to vector<2x1x8xi32>
    %7 = arith.cmpi sge, %5, %6 : vector<2x1x8xi32>
    %cst_11 = arith.constant 0.176776692 : f32
    %8 = vector.broadcast %cst_11 : f32 to vector<2x1x8xf32>
    %9 = arith.mulf %4, %8 : vector<2x1x8xf32>
    %cst_12 = arith.constant -1.000000e+30 : f32
    %10 = vector.broadcast %cst_12 : f32 to vector<2x1x8xf32>
    %11 = arith.select %7, %10, %9 : vector<2x1x8xi1>, vector<2x1x8xf32>
    %cst_13 = arith.constant dense<0xFF800000> : vector<2x1xf32>
    %12 = vector.multi_reduction <maximumf>, %11, %cst_13 [2] : vector<2x1x8xf32> to vector<2x1xf32>
    %13 = vector.shape_cast %12 : vector<2x1xf32> to vector<2x1x1xf32>
    %14 = vector.broadcast %13 : vector<2x1x1xf32> to vector<2x1x8xf32>
    %15 = arith.subf %11, %14 : vector<2x1x8xf32>
    %16 = math.exp %15 : vector<2x1x8xf32>
    %cst_14 = arith.constant dense<0.000000e+00> : vector<2x1xf32>
    %17 = vector.multi_reduction <add>, %16, %cst_14 [2] : vector<2x1x8xf32> to vector<2x1xf32>
    %18 = vector.shape_cast %17 : vector<2x1xf32> to vector<2x1x1xf32>
    %19 = vector.broadcast %18 : vector<2x1x1xf32> to vector<2x1x8xf32>
    %20 = arith.divf %16, %19 : vector<2x1x8xf32>
    %c0_15 = arith.constant 0 : index
    %c0_16 = arith.constant 0 : index
    %c0_17 = arith.constant 0 : index
    %21 = vector.load %arg6[%c0_15, %c0_16, %c0_17] : memref<2x1x8xf32, #tpu.memory_space<vmem>>, vector<2x1x8xf32>
    tpu.vector_store %arg6[%c0_15, %c0_16, %c0_17], %20 {strides = array<i32>} : memref<2x1x8xf32, #tpu.memory_space<vmem>>, vector<2x1x8xf32>,
    "tpu.trace_start"() <{level = 10 : i32, message = "bqt,btd->bqd"}> : () -> ()
    %cst_18 = arith.constant dense<0.000000e+00> : vector<2x1x32xf32>
    %22 = tpu.matmul %20, %2, %cst_18 {dimension_numbers = #tpu.dot_dimension_numbers<[2], [1], [1], [2], [0, 0, 0, 1, 1, 2], [0], [0]>} : vector<2x1x8xf32>, vector<2x8x32xf32>, vector<2x1x32xf32> -> vector<2x1x32xf32>
    "tpu.trace_stop"() : () -> ()
    %c0_19 = arith.constant 0 : index
    %c0_20 = arith.constant 0 : index
    %c0_21 = arith.constant 0 : index
    %23 = vector.load %arg5[%c0_19, %c0_20, %c0_21] : memref<2x1x32xf32, #tpu.memory_space<vmem>>, vector<2x1x32xf32>
    tpu.vector_store %arg5[%c0_19, %c0_20, %c0_21], %22 {strides = array<i32>} : memref<2x1x32xf32, #tpu.memory_space<vmem>>, vector<2x1x32xf32>,
    return
  }
  func.func @transform_0(%arg0: i32) -> (i32, i32, i32) {
    %c0_i32 = arith.constant 0 : i32
    %c0_i32_0 = arith.constant 0 : i32
    %c0_i32_1 = arith.constant 0 : i32
    return %arg0, %c0_i32, %c0_i32_0 : i32, i32, i32
  }
  func.func @transform_1(%arg0: i32) -> (i32, i32, i32) {
    %c0_i32 = arith.constant 0 : i32
    %c0_i32_0 = arith.constant 0 : i32
    %c0_i32_1 = arith.constant 0 : i32
    return %arg0, %c0_i32, %c0_i32_0 : i32, i32, i32
  }
  func.func @transform_2(%arg0: i32) -> (i32, i32, i32) {
    %c0_i32 = arith.constant 0 : i32
    %c0_i32_0 = arith.constant 0 : i32
    %c0_i32_1 = arith.constant 0 : i32
    return %arg0, %c0_i32, %c0_i32_0 : i32, i32, i32
  }
  func.func @transform_3(%arg0: i32) -> (i32, i32, i32) {
    %c0_i32 = arith.constant 0 : i32
    %c0_i32_0 = arith.constant 0 : i32
    %c0_i32_1 = arith.constant 0 : i32
    return %arg0, %c0_i32, %c0_i32_0 : i32, i32, i32
  }
  func.func @transform_4(%arg0: i32) -> (i32, i32, i32) {
    %c0_i32 = arith.constant 0 : i32
    %c0_i32_0 = arith.constant 0 : i32
    %c0_i32_1 = arith.constant 0 : i32
    return %arg0, %c0_i32, %c0_i32_0 : i32, i32, i32
  }
  func.func @transform_5(%arg0: i32) -> (i32, i32, i32) {
    %c0_i32 = arith.constant 0 : i32
    %c0_i32_0 = arith.constant 0 : i32
    %c0_i32_1 = arith.constant 0 : i32
    return %arg0, %c0_i32, %c0_i32_0 : i32, i32, i32
  }
}

</mosaic_0001>

<bundles_post_ra>
// kernel: tpu_custom_call.1
= control target key start
LH: loop header
LB: loop body
LE: loop exit
PB: predicated region body
PF: predicated region fallthrough
CT: control target
= control target key end

     0   :  { %s1727_s0 = inlined_call_operand.hbm [shape: f32[8,1,32], index: 0, kind: input, shape index: {}]   ;;  %s1728_s1 = inlined_call_operand.hbm [shape: f32[8,8,32], index: 1, kind: input, shape index: {}]   ;;  %s1729_s2 = inlined_call_operand.hbm [shape: f32[8,8,32], index: 2, kind: input, shape index: {}]   ;;  %s1730_s3 = inlined_call_operand.hbm [shape: s32[8,1,1], index: 3, kind: input, shape index: {}]   ;;  %s1731_s4 = inlined_call_operand.hbm [shape: f32[8,1,32], index: 4, kind: output, shape index: {0}]   ;;  %s1732_s5 = inlined_call_operand.hbm [shape: f32[8,1,8], index: 5, kind: output, shape index: {1}]  }
   0x1   :  { %1742 = sst [smem:[#allocation20_spill]] %s1728_s1 }
   0x2   :  { %11 = vsyncpa [#allocation3], 0 }
   0x3   :  { %13 = vsyncpa [#allocation3 + $0x1], 0 }
   0x4   :  { %14 = vsyncpa [#allocation6], 0 }
   0x5   :  { %16 = vsyncpa [#allocation6 + $0x1], 0 }
   0x6   :  { %17 = vsyncpa [#allocation9], 0 }
   0x7   :  { %19 = vsyncpa [#allocation9 + $0x1], 0 }
   0x8   :  { %20 = vsyncpa [#allocation4], 0 }
   0x9   :  { %22 = vsyncpa [#allocation4 + $0x1], 0 }
   0xa   :  { %23 = vsyncpa [#allocation12], 0 }
   0xb   :  { %25 = vsyncpa [#allocation12 + $0x1], 0  ;;  %s1368_s18 = smov 0   ;;  %s1370_s19 = smov 0  }
   0xc   :  { %s1372_s20 = smov 0   ;;  %s1374_s21 = smov 0  }
   0xd LB: > { %1743 = sst [smem:[#allocation18_spill]] %s1317_s20  ;;  %s1389_s22 = sadd.s32 4294967295, %s1321_s21   ;;  %s1321_s21 = sphi %s1374_s21, %s1766_s21   ;;  %s1317_s20 = sphi %s1372_s20, %s1763_s20   ;;  %s1313_s19 = sphi %s1370_s19, %s1765_s19   ;;  %s1309_s18 = sphi %s1368_s18, %s1764_s18  }
   0xe   : > { %s941_s23 = sadd.s32 4294967294, %s1321_s21   ;;  %s1393_s24 = sadd.s32 1, %s1321_s21  }
   0xf   : > { %s38_s25 = sadd.s32 1, %s1317_s20  ;;  %s35_s26 = ssub.s32 %s1321_s21, %s1393_s24 }
  0x10   : > { %p45_p0 = scmp.ne.s32.totalorder %s1317_s20, %s1313_s19  ;;  %p36_p1 = scmp.eq.s32.totalorder %s35_s26, 0 }
  0x11   : > { %p46_p2 = scmp.eq.s32.totalorder %s1321_s21, 0  ;;  %p51_p3 = scmp.ne.s32.totalorder %s1313_s19, %s1309_s18 }
  0x12   : > { %p52_p4 = scmp.eq.s32.totalorder %s1389_s22, 0  ;;  %p153_p7 = scmp.eq.s32.totalorder %s1389_s22, 3 }
  0x13   : > { %s1405_s27 = scalar_select %p36_p1, %s1317_s20, %s38_s25  }
  0x14   : > { %p47_p5 = por %p46_p2, %p45_p0  ;;  %p1407_p6 = por %p52_p4, %p51_p3 }
  0x15   : > { %1744 = sst [smem:[#allocation19_spill]] %s1405_s27  ;;  %p159_p8 = scmp.eq.s32.totalorder %s941_s23, 3 }
  0x16   : > { %s1745_s28 = scalar_select %p1407_p6, 1, 0 }
  0x17   : > { %p1043_p9 = scmp.lt.s32.totalorder %s1321_s21, 4  ;;  %p1413_p10 = por %p153_p7, %p45_p0 }
  0x18   : > { %p1417_p11 = por %p159_p8, %p51_p3  ;;  %s1422_s6 = sand.u32 1, %s1317_s20  }
  0x19   : > { %s1746_s29 = scalar_select %p1413_p10, 1, 0 }
  0x1a   : > { %s1747_s30 = scalar_select %p1417_p11, 1, 0 }
  0x1b   : > { %p1424_p12 = pnand %p1043_p9, %p47_p5  ;;  %s226_s8 = sand.u32 1, %s1321_s21  }
  0x1c   : > { %s947_s9 = sshll.u32 %s1422_s6, 4  ;;  %s978_s10 = sshll.u32 %s1321_s21, 8 }
  0x1d   : > { %s1749_s1 = sld [smem:[#allocation20_spill]]  ;;  %s230_s14 = scalar_lea.vmem [#allocation5], %s947_s9 }
  0x1e   : > { %s237_s15 = sshll.u32 %s230_s14, 4  ;;  %s1442_s16 = scalar_lea.sflag [#allocation6], %s226_s8  ;;  %s1440_s15 = int_to_ptr.vmem [resolvable:$true] %s237_s15 }
  0x1f   : > { %p1448_p0 = pneg %p1424_p12 }
  0x23   : > { %s1436_s13 = scalar_lea.hbm %s1749_s1, %s978_s10  ;;  %s1100_s11 = scalar_lea.hbm %s1749_s1, 1024 }
  0x24   : > { %s1095_s17 = scalar_lea.hbm %s1436_s13, 256  ;;  %p1101_p3 = scmp.lt.u32.totalorder %s1436_s13, %s1749_s1 }
  0x25   : > { %p1096_p13 = scmp.ne.s32.totalorder %s1436_s13, %s1095_s17  ;;  %p1102_p4 = scmp.lt.u32.totalorder %s1100_s11, %s1095_s17 }
  0x26   : > { %p1104_p7 = scmp.lt.u32.totalorder %s1095_s17, %s1436_s13 }
  0x27   : > { %p1098_p1 = pnand %p1448_p0, %p1096_p13  ;;  %p1103_p5 = por %p1102_p4, %p1101_p3 }
  0x29   : > { %p1099_p2 = pneg %p1098_p1  ;;  %p1105_p8 = por %p1104_p7, %p1103_p5 }
  0x2b   : > { %p1106_p9 = pnand %p1105_p8, %p1099_p2 }
  0x2d   : > { %1109 = shalt.err (!%p1106_p9)
}
  0x2e   : > { %s1110_s8 = scalar_lea.vmem %s1440_s15, 256  ;;  %s1323_s25 = smov [#allocation5]  }
  0x2f   : > { %p1111_p13 = scmp.ne.s32.totalorder %s1440_s15, %s1110_s8  ;;  %s1115_s26 = sshll.u32 %s1323_s25, 4  ;;  %s1116_s26 = int_to_ptr.vmem [resolvable:$false] %s1115_s26 }
  0x30   : > { %s1117_s12 = scalar_lea.vmem %s1116_s26, 512  ;;  %p1118_p10 = scmp.lt.s32.totalorder %s1440_s15, %s1116_s26 }
  0x31   : > { %p1113_p1 = pnand %p1111_p13, %p1448_p0  ;;  %p1119_p6 = scmp.lt.s32.totalorder %s1117_s12, %s1110_s8 }
  0x33   : > { %p1114_p11 = pneg %p1113_p1  ;;  %p1120_p3 = por %p1119_p6, %p1118_p10 }
  0x35   : > { %p1121_p4 = pnand %p1120_p3, %p1114_p11 }
  0x37   : > { %1124 = shalt.err (!%p1121_p4)
}
  0x38   : > { %s1736_s17 = smov 128   ;;  %s1737_s11 = smov 8  }
  0x39   : > { %1029 = dma.hbm_to_vmem [thread:$0]  (!%p1424_p12), %s1436_s13, 256, %s1440_s15, %s1442_s16, %s1736_s17, %s1736_s17, %s1737_s11  }
  0x3a   : > { %s1480_s25 = scalar_lea.hbm %s1729_s2, %s978_s10  ;;  %s251_s26 = scalar_lea.vmem [#allocation7], %s947_s9 }
  0x3b   : > { %s258_s12 = sshll.u32 %s251_s26, 4  ;;  %p956_p6 = scmp.ge.s32.totalorder %s1321_s21, 1  ;;  %s1484_s12 = int_to_ptr.vmem [resolvable:$true] %s258_s12 }
  0x3c   : > { %p287_p10 = scmp.lt.s32.totalorder %s1321_s21, 5  ;;  %s1739_s1 = sshll.u32 %s1422_s6, 1 }
  0x3d   : > { %s1738_s27 = sshll.u32 %s1321_s21, 5  ;;  %s209_s9 = scalar_lea.vmem [#allocation2], %s1739_s1 }
  0x3e   : > { %p1490_p11 = pnand %p956_p6, %p287_p10  ;;  %s1499_s10 = scalar_lea.hbm %s1727_s0, %s1738_s27 }
  0x3f   : > { %s216_s14 = sshll.u32 %s209_s9, 4  ;;  %s206_s8 = scalar_lea.sflag [#allocation3], %s1422_s6  ;;  %s1503_s14 = int_to_ptr.vmem [resolvable:$true] %s216_s14 }
  0x40   : > { %s1751_s20 = scalar_select %p1490_p11, 1, 0 }
  0x41   : > { %s1125_s26 = scalar_lea.hbm %s1499_s10, 32  ;;  %s1130_s13 = scalar_lea.hbm %s1727_s0, 128 }
  0x42   : > { %p1126_p2 = scmp.ne.s32.totalorder %s1499_s10, %s1125_s26  ;;  %p1131_p8 = scmp.lt.u32.totalorder %s1499_s10, %s1727_s0 }
  0x43   : > { %p1132_p9 = scmp.lt.u32.totalorder %s1130_s13, %s1125_s26  ;;  %p1134_p1 = scmp.lt.u32.totalorder %s1125_s26, %s1499_s10 }
  0x44   : > { %p1128_p5 = pnand %p1126_p2, %p1448_p0 }
  0x45   : > { %p1133_p13 = por %p1132_p9, %p1131_p8 }
  0x46   : > { %p1129_p7 = pneg %p1128_p5 }
  0x47   : > { %p1135_p3 = por %p1134_p1, %p1133_p13 }
  0x49   : > { %p1136_p4 = pnand %p1135_p3, %p1129_p7 }
  0x4b   : > { %1139 = shalt.err (!%p1136_p4)
}
  0x4c   : > { %s1140_s9 = scalar_lea.vmem %s1503_s14, 32  ;;  %s1326_s17 = smov [#allocation2]  }
  0x4d   : > { %p1141_p6 = scmp.ne.s32.totalorder %s1503_s14, %s1140_s9  ;;  %s1145_s11 = sshll.u32 %s1326_s17, 4  ;;  %s1146_s11 = int_to_ptr.vmem [resolvable:$false] %s1145_s11 }
  0x4e   : > { %s1147_s27 = scalar_lea.vmem %s1146_s11, 64  ;;  %p1148_p5 = scmp.lt.s32.totalorder %s1503_s14, %s1146_s11 }
  0x4f   : > { %p1143_p10 = pnand %p1141_p6, %p1448_p0  ;;  %p1149_p11 = scmp.lt.s32.totalorder %s1147_s27, %s1140_s9 }
  0x51   : > { %p1144_p2 = pneg %p1143_p10  ;;  %p1150_p8 = por %p1149_p11, %p1148_p5 }
  0x53   : > { %p1151_p9 = pnand %p1150_p8, %p1144_p2 }
  0x55   : > { %1154 = shalt.err (!%p1151_p9)
}
  0x56   : > { %s1740_s26 = smov 16   ;;  %s1741_s13 = smov 1  }
  0x57   : > { %1026 = dma.hbm_to_vmem [thread:$0]  (!%p1424_p12), %s1499_s10, 32, %s1503_s14, %s206_s8, %s1740_s26, %s1740_s26, %s1741_s13  }
  0x58   : > { %s1155_s15 = scalar_lea.hbm %s1480_s25, 256  ;;  %s1160_s11 = scalar_lea.hbm %s1729_s2, 1024 }
  0x59   : > { %p1156_p11 = scmp.ne.s32.totalorder %s1480_s25, %s1155_s15  ;;  %p1161_p1 = scmp.lt.u32.totalorder %s1480_s25, %s1729_s2 }
  0x5a   : > { %p1162_p3 = scmp.lt.u32.totalorder %s1160_s11, %s1155_s15  ;;  %p1164_p6 = scmp.lt.u32.totalorder %s1155_s15, %s1480_s25 }
  0x5b   : > { %p1158_p7 = pnand %p1156_p11, %p1448_p0 }
  0x5c   : > { %p1163_p4 = por %p1162_p3, %p1161_p1 }
  0x5d   : > { %p1159_p13 = pneg %p1158_p7 }
  0x5e   : > { %p1165_p10 = por %p1164_p6, %p1163_p4 }
  0x60   : > { %p1166_p2 = pnand %p1165_p10, %p1159_p13 }
  0x62   : > { %1169 = shalt.err (!%p1166_p2)
}
  0x63   : > { %s1170_s10 = scalar_lea.vmem %s1484_s12, 256  ;;  %s1329_s14 = smov [#allocation7]  }
  0x64   : > { %p1171_p5 = scmp.ne.s32.totalorder %s1484_s12, %s1170_s10  ;;  %s1175_s8 = sshll.u32 %s1329_s14, 4  ;;  %s1176_s8 = int_to_ptr.vmem [resolvable:$false] %s1175_s8 }
  0x65   : > { %s1177_s1 = scalar_lea.vmem %s1176_s8, 512  ;;  %p1178_p11 = scmp.lt.s32.totalorder %s1484_s12, %s1176_s8 }
  0x66   : > { %p1173_p8 = pnand %p1171_p5, %p1448_p0  ;;  %p1179_p7 = scmp.lt.s32.totalorder %s1177_s1, %s1170_s10 }
  0x68   : > { %p1174_p9 = pneg %p1173_p8  ;;  %p1180_p1 = por %p1179_p7, %p1178_p11 }
  0x6a   : > { %p1181_p3 = pnand %p1180_p1, %p1174_p9 }
  0x6c   : > { %1184 = shalt.err (!%p1181_p3)
}
  0x6d   : > { %s1752_s15 = smov 8   ;;  %s1753_s9 = smov 128  }
  0x6e   : > { %1032 = dma.hbm_to_vmem [thread:$0]  (!%p1424_p12), %s1480_s25, 256, %s1484_s12, %s1442_s16, %s1753_s9, %s1753_s9, %s1752_s15  }
  0x6f   : > { %s1754_s17 = sshll.u32 %s1321_s21, 5  ;;  %s1755_s14 = sshll.u32 %s1422_s6, 1 }
  0x70   : > { %s1562_s10 = scalar_lea.hbm %s1730_s3, %s1754_s17  ;;  %s272_s8 = scalar_lea.vmem [#allocation8], %s1755_s14 }
  0x71   : > { %s279_s1 = sshll.u32 %s272_s8, 4  ;;  %s269_s26 = scalar_lea.sflag [#allocation9], %s1422_s6  ;;  %s1566_s1 = int_to_ptr.vmem [resolvable:$true] %s279_s1 }
  0x72   : > { %s1185_s13 = scalar_lea.hbm %s1562_s10, 32  ;;  %s1190_s12 = scalar_lea.hbm %s1730_s3, 128 }
  0x73   : > { %p1186_p13 = scmp.ne.s32.totalorder %s1562_s10, %s1185_s13  ;;  %p1191_p10 = scmp.lt.u32.totalorder %s1562_s10, %s1730_s3 }
  0x74   : > { %p1192_p2 = scmp.lt.u32.totalorder %s1190_s12, %s1185_s13  ;;  %p1194_p8 = scmp.lt.u32.totalorder %s1185_s13, %s1562_s10 }
  0x75   : > { %p1188_p4 = pnand %p1186_p13, %p1448_p0 }
  0x76   : > { %p1193_p5 = por %p1192_p2, %p1191_p10 }
  0x77   : > { %p1189_p6 = pneg %p1188_p4 }
  0x78   : > { %p1195_p9 = por %p1194_p8, %p1193_p5 }
  0x7a   : > { %p1196_p11 = pnand %p1195_p9, %p1189_p6 }
  0x7c   : > { %1199 = shalt.err (!%p1196_p11)
}
  0x7d   : > { %s1200_s17 = scalar_lea.vmem %s1566_s1, 32  ;;  %s1330_s11 = smov [#allocation8]  }
  0x7e   : > { %p1201_p7 = scmp.ne.s32.totalorder %s1566_s1, %s1200_s17  ;;  %s1205_s27 = sshll.u32 %s1330_s11, 4  ;;  %s1206_s27 = int_to_ptr.vmem [resolvable:$false] %s1205_s27 }
  0x7f   : > { %s1207_s14 = scalar_lea.vmem %s1206_s27, 64  ;;  %p1208_p13 = scmp.lt.s32.totalorder %s1566_s1, %s1206_s27 }
  0x80   : > { %p1203_p1 = pnand %p1201_p7, %p1448_p0  ;;  %p1209_p4 = scmp.lt.s32.totalorder %s1207_s14, %s1200_s17 }
  0x82   : > { %p1204_p3 = pneg %p1203_p1  ;;  %p1210_p10 = por %p1209_p4, %p1208_p13 }
  0x84   : > { %p1211_p2 = pnand %p1210_p10, %p1204_p3 }
  0x86   : > { %1214 = shalt.err (!%p1211_p2)
}
  0x87   : > { %s1756_s13 = smov 1   ;;  %s1757_s8 = smov 16  }
  0x88   : > { %1035 = dma.hbm_to_vmem [thread:$0]  (!%p1424_p12), %s1562_s10, 32, %s1566_s1, %s269_s26, %s1757_s8, %s1757_s8, %s1756_s13  }
  0x89   : > { %p1758_p0 = scmp.ne.s32.totalorder %s1751_s20, 0 }
  0x8a   : > { %s1598_s23 = sand.u32 (!%p1758_p0), 1, %s1313_s19   ;;  %p1759_p6 = scmp.ne.s32.totalorder (!%p1758_p0), %s1745_s28, 0 }
  0x8b   : > { %291 = sbr.rel (%p1758_p0) target bundleno = 918 (0x396), region = 36  ;;  %s1601_s16 = sshll.u32 (!%p1758_p0), %s1598_s23, 1 }
  0x8c   : > { %s294_s7 = scalar_lea.sflag (!%p1758_p0), [#allocation3], %s1598_s23  ;;  %s297_s25 = scalar_lea.vmem (!%p1758_p0), [#allocation2], %s1601_s16 }
  0x92   : > { %1288 = dma.done.wait (%p1759_p6), %s294_s7, 32  }
  0x93   : > { %1290 = vsyncadd (%p1759_p6), %s294_s7, 4294967264  ;;  %s302_s20 = sand.u32 1, %s1389_s22   ;;  %s958_s6 = sshll.u32 %s1598_s23, 4 }
  0x94   : > { %s303_s26 = scalar_lea.sflag [#allocation6], %s302_s20  ;;  %s306_s10 = scalar_lea.vmem [#allocation5], %s958_s6 }
  0x95   : > { %1292 = dma.done.wait (%p1759_p6), %s303_s26, 512  }
  0x96   : > { %1294 = vsyncadd (%p1759_p6), %s303_s26, 4294966784  ;;  %s1615_s1 = scalar_lea.vmem [#allocation7], %s958_s6  ;;  %s321_s12 = scalar_lea.sflag [#allocation9], %s1598_s23 }
  0x97   : > { %s324_s15 = scalar_lea.vmem [#allocation8], %s1601_s16 }
  0x98   : > { %1296 = dma.done.wait (%p1759_p6), %s321_s12, 32  }
  0x99   : > { %1298 = vsyncadd (%p1759_p6), %s321_s12, 4294967264  ;;  %v1331_v0 = vmov 0.0   ;;  %vm1332_vm0 = vmmov 0   ;;  %v1333_v1 = vmov 0   ;;  %vm385_vm1 = vcmask 261120   ;;  %v379_v2 = vld [vmem:[%s306_s10] sm:$0xff] }
  0x9a   : > { %991 = vmatprep.subr.mxu0 %v1331_v0  ;;  %996 = vmatprep.subr.mxu1 %v1331_v0  ;;  %v380_v3 = vld [vmem:[%s306_s10 + $0x8] sm:$0xff]  ;;  %v383_v6 = vld [vmem:[%s324_s15] sm:$0x1]  ;;  %v384_v7 = vld [vmem:[%s324_s15 + $0x1] sm:$0x1]  ;;  %v538_v8 = vlaneseq  ;;  %vm560_vm3 = vcmask 57344  }
  0x9b   : > { %993 = vmatprep.mubr.msk.f32.mxu0 %vm1332_vm0, %v1331_v0  ;;  %998 = vmatprep.mubr.msk.f32.mxu1 %vm1332_vm0, %v1331_v0  ;;  %v377_v4 = vld [vmem:[%s297_s25] sm:$0x1]  ;;  %v378_v5 = vld [vmem:[%s297_s25 + $0x1] sm:$0x1]  ;;  %v381_v36 = vld [vmem:[%s1615_s1] sm:$0xff]  ;;  %vm585_vm5 = vcmask 64512  }
  0x9c   : > { %1086 = vset.pattern.permute.xlu0 %v1333_v1  ;;  %992 = vmatpush3.xpose.msk.msra.mxu0 %vm385_vm1, %v379_v2  ;;  %v544_v9 = vshrl.u32 %v538_v8, 7  ;;  %v539_v14 = vand.u32 127, %v538_v8  ;;  %v382_v37 = vld [vmem:[%s1615_s1 + $0x8] sm:$0xff]  ;;  %s370_s28 = scalar_lea.vmem [#allocation11], %s1601_s16  ;;  %s981_s9 = sshll.u32 %s1389_s22, 5 }
  0x9d   : > { %997 = vmatpush3.xpose.msk.msra.mxu1 %vm385_vm1, %v380_v3  ;;  %541 = vperm.xlu0 %1086, %v383_v6   ;;  %s770_s17 = sshll.u32 %s370_s28, 4  ;;  %s1642_s14 = scalar_lea.hbm %s1732_s5, %s981_s9  ;;  %s1644_s17 = int_to_ptr.vmem [resolvable:$true] %s770_s17 }
  0x9e   : > { %1001 = vmatprep.subr.mxu0 %v1331_v0  ;;  %1006 = vmatprep.subr.mxu1 %v1331_v0  ;;  %v545_v11 = vsub.s32 0, %v544_v9  ;;  %s741_s13 = scalar_lea.sflag [#allocation12], %s1598_s23  ;;  %s1215_s8 = scalar_lea.vmem %s1644_s17, 32 }
  0x9f   : > { %994 = vmatmul.mubr.msk.f32.vlgmr.msra.gmra.mrb[0].mxu0 %vm385_vm1, %v377_v4  ;;  %p1216_p12 = scmp.ne.s32.totalorder %s1644_s17, %s1215_s8  ;;  %p1760_p5 = scmp.ne.s32.totalorder %s1746_s29, 0 }
  0xa0   : > { %999 = vmatmul.mubr.msk.f32.vlgmr.msra.gmra.mrb[0].mxu1 %vm385_vm1, %v378_v5  ;;  %1003 = vmatprep.mubr.msk.f32.mxu0 %vm1332_vm0, %v1331_v0  ;;  %s1334_s7 = smov [#allocation11]  }
  0xa1   : > { %1008 = vmatprep.mubr.msk.f32.mxu1 %vm1332_vm0, %v1331_v0  ;;  %548 = vperm.xlu0 %1086, %v384_v7   ;;  %p1217_p8 = pnand %p1216_p12, %p1760_p5  ;;  %s1219_s25 = sshll.u32 %s1334_s7, 4  ;;  %s1220_s25 = int_to_ptr.vmem [resolvable:$false] %s1219_s25 }
  0xa2   : > { %1002 = vmatpush3.msra.mxu0 %v381_v36  ;;  %1007 = vmatpush3.msra.mxu1 %v382_v37  ;;  %s1221_s20 = scalar_lea.vmem %s1220_s25, 64  ;;  %p1222_p11 = scmp.lt.s32.totalorder %s1644_s17, %s1220_s25 }
  0xa3   : > { %p1218_p9 = pneg %p1217_p8  ;;  %p1223_p7 = scmp.lt.s32.totalorder %s1221_s20, %s1215_s8 }
  0xa5   : > { %p1224_p1 = por %p1223_p7, %p1222_p11 }
  0xa7   : > { %p1225_p3 = pnand %p1224_p1, %p1218_p9 }
 0x11c   : > { %v542_v10 = vpop.permute.xlu0 %541 }
 0x11d   : > { %v546_v13 = vrot.slane %v542_v10, %v545_v11 }
 0x11f   : > { %vm554_vm2 = vcmp.ge.s32.totalorder %v539_v14, %v546_v13 }
 0x120   : > { %v549_v12 = vpop.permute.xlu0 %548 }
 0x121   : > { %v553_v15 = vrot.slane %v549_v12, %v545_v11 }
 0x123   : > { %vm555_vm4 = vcmp.ge.s32.totalorder %v539_v14, %v553_v15 }
 0x172   : > { %v458_v16 = vpop.f32.mrb[0].mxu0 }
 0x173   : > { %v534_v17 = vpop.f32.mrb[0].mxu1  ;;  %v556_v18 = vmul.f32 0.17677669, %v458_v16  ;;  %v995_v20 = vpop.f32.mrb[1].mxu0 }
 0x174   : > { %v557_v19 = vmul.f32 0.17677669, %v534_v17  ;;  %v1000_v21 = vpop.f32.mrb[1].mxu1 }
 0x175   : > { %v558_v22 = vsel %vm554_vm2, -1e+30, %v556_v18 }
 0x176   : > { %v561_v23 = vsel %vm560_vm3, %v558_v22, -inf  ;;  %v559_v24 = vsel %vm555_vm4, -1e+30, %v557_v19 }
 0x177   : > { %562 = vmax.xlane.f32.xlu1 %v561_v23  ;;  %v564_v25 = vsel %vm560_vm3, %v559_v24, -inf }
 0x17b   : > { %565 = vmax.xlane.f32.xlu1 %v564_v25 }
 0x204   : > { %v563_v26 = vpop.xlane.xlu1 %562 }
 0x205   : > { %v567_v27 = vsub.f32 %v558_v22, %v563_v26 }
 0x207   : > { %v569_v28 = vmul.f32 1.442695, %v567_v27 }
 0x208   : > { %v566_v29 = vpop.xlane.xlu1 %565 }
 0x209   : > { %1087 = vpow2.f32 %v569_v28  ;;  %v568_v30 = vsub.f32 %v559_v24, %v566_v29 }
 0x20b   : > { %v571_v31 = vmul.f32 1.442695, %v568_v30 }
 0x20d   : > { %1089 = vpow2.f32 %v571_v31 }
 0x213   : > { %v1088_v32 = vpop.eup %1087 }
 0x214   : > { %v573_v33 = vsel %vm560_vm3, %v1088_v32, 0.0 }
 0x215   : > { %574 = vadd.xlane.f32.xlu0 %v573_v33 }
 0x217   : > { %v1090_v34 = vpop.eup %1089 }
 0x218   : > { %v576_v35 = vsel %vm560_vm3, %v1090_v34, 0.0 }
 0x219   : > { %577 = vadd.xlane.f32.xlu1 %v576_v35 }
 0x2a2   : > { %v575_v38 = vpop.xlane.xlu0 %574 }
 0x2a3   : > { %1091 = vrcp.f32 %v575_v38 }
 0x2a6   : > { %v578_v39 = vpop.xlane.xlu1 %577 }
 0x2a7   : > { %1093 = vrcp.f32 %v578_v39 }
 0x2ad   : > { %v1092_v40 = vpop.eup %1091 }
 0x2ae   : > { %v580_v41 = vmul.f32 %v1092_v40, %v1088_v32 }
 0x2b0   : > { %1004 = vmatmul.mubr.msk.f32.vlgmr.msra.gmra.mrb[2].mxu0 %vm585_vm5, %v580_v41  ;;  %583 = vst.msk [vmem:[%s370_s28] sm:$0x1] %vm560_vm3, %v580_v41 }
 0x2b1   : > { %v1094_v42 = vpop.eup %1093 }
 0x2b2   : > { %v582_v43 = vmul.f32 %v1094_v42, %v1090_v34 }
 0x2b4   : > { %1009 = vmatmul.mubr.msk.f32.vlgmr.msra.gmra.mrb[2].mxu1 %vm585_vm5, %v582_v43  ;;  %584 = vst.msk [vmem:[%s370_s28 + $0x1] sm:$0x1] %vm560_vm3, %v582_v43 }
 0x2b5   : > { %1228 = shalt.err (!%p1225_p3)
}
 0x2b6   : > { %s1229_s6 = scalar_lea.hbm %s1642_s14, 32  ;;  %s1233_s1 = scalar_lea.hbm %s1732_s5, 128 }
 0x2b7   : > { %p1230_p13 = scmp.ne.s32.totalorder %s1642_s14, %s1229_s6  ;;  %p1234_p2 = scmp.lt.u32.totalorder %s1642_s14, %s1732_s5 }
 0x2b8   : > { %p1235_p0 = scmp.lt.u32.totalorder %s1233_s1, %s1229_s6  ;;  %p1237_p12 = scmp.lt.u32.totalorder %s1229_s6, %s1642_s14 }
 0x2b9   : > { %p1231_p4 = pnand %p1230_p13, %p1760_p5 }
 0x2ba   : > { %p1236_p6 = por %p1235_p0, %p1234_p2 }
 0x2bb   : > { %p1232_p10 = pneg %p1231_p4 }
 0x2bc   : > { %p1238_p8 = por %p1237_p12, %p1236_p6 }
 0x2be   : > { %p1239_p9 = pnand %p1238_p8, %p1232_p10 }
 0x2c0   : > { %1242 = shalt.err (!%p1239_p9)
}
 0x2c1   : > { %s1335_s28 = smov 16   ;;  %s1336_s11 = smov 1   ;;  %vm732_vm6 = vcmask 253952  }
 0x2c2   : > { %1020 = dma.vmem_to_hbm [thread:$0]  (%p1760_p5), %s1644_s17, 32, %s1642_s14, %s741_s13, %s1335_s28, %s1335_s28, %s1336_s11  }
 0x2c3   : > { %s363_s27 = scalar_lea.vmem [#allocation10], %s1601_s16  ;;  %s1681_s20 = scalar_lea.hbm %s1731_s4, %s981_s9 }
 0x2c4   : > { %s754_s8 = sshll.u32 %s363_s27, 4  ;;  %s736_s17 = scalar_lea.sflag [#allocation4], %s1598_s23  ;;  %s1674_s8 = int_to_ptr.vmem [resolvable:$true] %s754_s8 }
 0x2c5   : > { %s1243_s16 = scalar_lea.vmem %s1674_s8, 32  ;;  %s1337_s14 = smov [#allocation10]  }
 0x2c6   : > { %p1244_p11 = scmp.ne.s32.totalorder %s1674_s8, %s1243_s16  ;;  %s1247_s13 = sshll.u32 %s1337_s14, 4  ;;  %s1248_s13 = int_to_ptr.vmem [resolvable:$false] %s1247_s13 }
 0x2c7   : > { %s1249_s22 = scalar_lea.vmem %s1248_s13, 64  ;;  %p1250_p3 = scmp.lt.s32.totalorder %s1674_s8, %s1248_s13 }
 0x2c8   : > { %p1245_p7 = pnand %p1244_p11, %p1760_p5  ;;  %p1251_p13 = scmp.lt.s32.totalorder %s1249_s22, %s1243_s16 }
 0x2ca   : > { %p1246_p1 = pneg %p1245_p7  ;;  %p1252_p4 = por %p1251_p13, %p1250_p3 }
 0x2cc   : > { %p1253_p10 = pnand %p1252_p4, %p1246_p1 }
 0x383   : > { %v655_v44 = vpop.f32.mrb[2].mxu0 }
 0x384   : > { %733 = vst.msk [vmem:[%s363_s27] sm:$0x1] %vm732_vm6, %v655_v44  ;;  %v1005_v45 = vpop.f32.mrb[3].mxu0 }
 0x387   : > { %v728_v46 = vpop.f32.mrb[2].mxu1 }
 0x388   : > { %734 = vst.msk [vmem:[%s363_s27 + $0x1] sm:$0x1] %vm732_vm6, %v728_v46  ;;  %v1010_v47 = vpop.f32.mrb[3].mxu1 }
 0x389   : > { %1256 = shalt.err (!%p1253_p10)
}
 0x38a   : > { %s1257_s9 = scalar_lea.hbm %s1681_s20, 32  ;;  %s1261_s10 = scalar_lea.hbm %s1731_s4, 128 }
 0x38b   : > { %p1258_p2 = scmp.ne.s32.totalorder %s1681_s20, %s1257_s9  ;;  %p1262_p12 = scmp.lt.u32.totalorder %s1681_s20, %s1731_s4 }
 0x38c   : > { %p1263_p8 = scmp.lt.u32.totalorder %s1261_s10, %s1257_s9  ;;  %p1265_p11 = scmp.lt.u32.totalorder %s1257_s9, %s1681_s20 }
 0x38d   : > { %p1259_p0 = pnand %p1258_p2, %p1760_p5 }
 0x38e   : > { %p1264_p9 = por %p1263_p8, %p1262_p12 }
 0x38f   : > { %p1260_p6 = pneg %p1259_p0 }
 0x390   : > { %p1266_p7 = por %p1265_p11, %p1264_p9 }
 0x392   : > { %p1267_p1 = pnand %p1266_p7, %p1260_p6 }
 0x394   : > { %1270 = shalt.err (!%p1267_p1)
}
 0x395   : > { %1019 = dma.vmem_to_hbm [thread:$0]  (%p1760_p5), %s1674_s8, 32, %s1681_s20, %s736_s17, %s1335_s28, %s1335_s28, %s1336_s11  }
 0x396 PF: > { %p1044_p3 = scmp.ge.s32.totalorder %s1321_s21, 2  ;;  %s785_s15 = sand.u32 1, %s1309_s18  }
 0x397   : > { %p1761_p13 = scmp.ne.s32.totalorder %s1747_s30, 0  ;;  %s786_s27 = scalar_lea.sflag [#allocation4], %s785_s15 }
 0x399   : > { %p1037_p4 = pnand %p1044_p3, %p1761_p13 }
 0x39b   : > { %1300 = dma.done.wait (!%p1037_p4), %s786_s27, 32  }
 0x39c   : > { %1302 = vsyncadd (!%p1037_p4), %s786_s27, 4294967264  ;;  %s795_s29 = scalar_lea.sflag [#allocation12], %s785_s15 }
 0x39d   : > { %1304 = dma.done.wait (!%p1037_p4), %s795_s29, 32  }
 0x39e   : > { %1306 = vsyncadd (!%p1037_p4), %s795_s29, 4294967264  ;;  %s1762_s23 = sld [smem:[#allocation18_spill]]  ;;  %s1763_s20 = sld [smem:[#allocation19_spill]] }
 0x39f   : > { %p28_p5 = scmp.ge.s32.totalorder %s1393_s24, 6   ;;  %s1764_s18 = smov %s1313_s19 }
 0x3a0   : > { %s1766_s21 = smov %s1393_s24 }
 0x3a1   :  { %30 = sbr.rel (!%p28_p5) target bundleno = 13 (0xd), region = 135 }
 0x3a4   : > { %s1765_s19 = smov %s1762_s23 }
 0x3a8   :  { %800 = vsyncpa [#allocation3], 1 }
 0x3a9   :  { %802 = vsyncpa [#allocation3 + $0x1], 1 }
 0x3aa   :  { %803 = vsyncpa [#allocation6], 1 }
 0x3ab   :  { %805 = vsyncpa [#allocation6 + $0x1], 1 }
 0x3ac   :  { %806 = vsyncpa [#allocation9], 1 }
 0x3ad   :  { %808 = vsyncpa [#allocation9 + $0x1], 1 }
 0x3ae   :  { %809 = vsyncpa [#allocation4], 1 }
 0x3af   :  { %811 = vsyncpa [#allocation4 + $0x1], 1 }
 0x3b0   :  { %812 = vsyncpa [#allocation12], 1 }
 0x3b1   :  { %814 = vsyncpa [#allocation12 + $0x1], 1 }

</bundles_post_ra>
